<compile_context>
chip_gen: v5e
topology: v5e:2x2
jax: 0.10.0
libtpu: 0.0.40
codegen_flags: <defaults>
</compile_context>

<pallas_src>
import functools
import math

import jax
import jax.numpy as jnp
from jax import lax
from jax.experimental import pallas as pl
from jax.experimental.pallas import tpu as pltpu


def _round_up(v, m):
    return ((v + m - 1) // m) * m


# ---------------------------------------------------------------------------
# Kernels
# ---------------------------------------------------------------------------
def _linear_kernel_single(x_ref, w_ref, b_ref, o_ref, *, compute_dtype):
    """Single K-step: no accumulator scratch, write straight into o_ref."""
    xa = x_ref[...]
    wa = w_ref[...]
    if compute_dtype is not None:
        xa = xa.astype(compute_dtype)
        wa = wa.astype(compute_dtype)
    o_ref[...] = (jnp.dot(xa, wa, preferred_element_type=jnp.float32)
                  + b_ref[...].astype(jnp.float32)).astype(o_ref.dtype)


def _linear_kernel_inplace(x_ref, w_ref, b_ref, o_ref, *, compute_dtype):
    """Multi K-step, f32 output: accumulate directly into the resident output
    block (saves a tm x tn VMEM scratch and a full-tile copy per output tile)."""
    k = pl.program_id(2)

    @pl.when(k == 0)
    def _():
        o_ref[...] = jnp.zeros_like(o_ref)

    xa = x_ref[...]
    wa = w_ref[...]
    if compute_dtype is not None:
        xa = xa.astype(compute_dtype)
        wa = wa.astype(compute_dtype)
    o_ref[...] += jnp.dot(xa, wa, preferred_element_type=jnp.float32)

    @pl.when(k == pl.num_programs(2) - 1)
    def _():
        o_ref[...] += b_ref[...].astype(o_ref.dtype)


def _linear_kernel_scratch(x_ref, w_ref, b_ref, o_ref, acc_ref, *, compute_dtype):
    """Multi K-step, non-f32 output: f32 VMEM accumulator, cast at the end."""
    k = pl.program_id(2)

    @pl.when(k == 0)
    def _():
        acc_ref[...] = jnp.zeros_like(acc_ref)

    xa = x_ref[...]
    wa = w_ref[...]
    if compute_dtype is not None:
        xa = xa.astype(compute_dtype)
        wa = wa.astype(compute_dtype)
    acc_ref[...] += jnp.dot(xa, wa, preferred_element_type=jnp.float32)

    @pl.when(k == pl.num_programs(2) - 1)
    def _():
        o_ref[...] = (acc_ref[...] + b_ref[...].astype(jnp.float32)
                      ).astype(o_ref.dtype)


# ---------------------------------------------------------------------------
# Tile selection
# ---------------------------------------------------------------------------
def _select_tiles(M, N_pad, K_pad, x_itemsize):
    # --- M (rows): big tiles amortize the ~600-cycle per-grid-step overhead.
    if M <= 1024:
        tm, M_pad = M, M                      # full dim (always legal), no pad
    else:
        tm = next((t for t in (1024, 512, 256, 128) if M % t == 0), None)
        if tm is None:
            tm = 512
            M_pad = _round_up(M, tm)          # padded rows are sliced away
        else:
            M_pad = M

    # --- N (output features): lane-dense multiples of 128 -> unmasked stores.
    if N_pad <= 1024:
        tn = N_pad
    else:
        tn = next(t for t in (1024, 512, 256, 128) if N_pad % t == 0)

    # --- K (reduction): always streamed; K_pad is a multiple of 128.
    if K_pad <= 512:
        tk = K_pad
    else:
        tk = next(t for t in (512, 256, 128) if K_pad % t == 0)

    # --- v7x megacore: guarantee >=2 blocks along a parallel axis so both
    # TensorCores get work; harmless (one extra cheap grid step) on 1-TC chips.
    min_sublane = max(8, 32 // x_itemsize)    # f32:8, bf16:16, int8:32
    if (M_pad // tm) * (N_pad // tn) == 1:
        if tn >= 256:
            tn //= 2
        elif tm % (2 * min_sublane) == 0:
            tm //= 2

    return tm, tn, tk, M_pad


# ---------------------------------------------------------------------------
# Forward
# ---------------------------------------------------------------------------
def linear_norm_forward(x, w_kernel, b_kernel, out_dim,
                        compute_dtype=jnp.bfloat16):
    """y = x @ W^T + b with W given in prepared kernel layout.

    x:         (..., in_dim)
    w_kernel:  (K_pad, N_pad)  -- prepared by prepare_linear_norm_params
    b_kernel:  (1, N_pad) float32
    out_dim:   logical output feature count (N_pad may be larger)
    compute_dtype: MXU input dtype (default bf16; accumulation always f32,
                   output keeps x.dtype). Pass None for pure-f32 compute.
    """
    in_dim = x.shape[-1]
    lead_shape = x.shape[:-1]
    out_dtype = x.dtype
    K_pad, N_pad = w_kernel.shape

    x2d = x.reshape(-1, in_dim)
    M = x2d.shape[0]

    # Pad the reduction dim with zeros (exact for a dot) only when unaligned.
    if in_dim != K_pad:
        x2d = jnp.pad(x2d, ((0, 0), (0, K_pad - in_dim)))

    tm, tn, tk, M_pad = _select_tiles(M, N_pad, K_pad, x2d.dtype.itemsize)
    if M_pad != M:
        x2d = jnp.pad(x2d, ((0, M_pad - M), (0, 0)))

    grid_m, grid_n, grid_k = M_pad // tm, N_pad // tn, K_pad // tk

    # VMEM budget estimate (double-buffered tiles + accumulator) -> scoped limit.
    x_b = x2d.dtype.itemsize
    w_b = w_kernel.dtype.itemsize
    o_b = jnp.dtype(out_dtype).itemsize
    vmem_est = 2 * (tm * tk * x_b + tk * tn * w_b + tm * tn * o_b + tn * 4) \
        + tm * tn * 4
    vmem_limit = int(min(64 * 1024 * 1024,
                         max(2 * vmem_est, 32 * 1024 * 1024)))

    cost = pl.CostEstimate(
        flops=2 * M_pad * N_pad * K_pad,
        transcendentals=0,
        bytes_accessed=(M_pad * K_pad * x_b + K_pad * N_pad * w_b
                        + M_pad * N_pad * o_b + N_pad * 4))

    if grid_k == 1:
        # Single K-step: 2-D grid, no scratch, direct store.
        out = pl.pallas_call(
            functools.partial(_linear_kernel_single, compute_dtype=compute_dtype),
            out_shape=jax.ShapeDtypeStruct((M_pad, N_pad), out_dtype),
            grid_spec=pltpu.PrefetchScalarGridSpec(
                num_scalar_prefetch=0,
                grid=(grid_m, grid_n),
                in_specs=[
                    pl.BlockSpec((tm, tk), lambda i, j: (i, 0)),   # x tile
                    pl.BlockSpec((tk, tn), lambda i, j: (0, j)),   # W tile
                    pl.BlockSpec((1, tn), lambda i, j: (0, j)),    # bias tile
                ],
                out_specs=pl.BlockSpec((tm, tn), lambda i, j: (i, j)),
            ),
            compiler_params=pltpu.CompilerParams(
                dimension_semantics=("parallel", "parallel"),
                vmem_limit_bytes=vmem_limit),
            cost_estimate=cost,
        )(x2d, w_kernel, b_kernel)
    else:
        use_inplace = (out_dtype == jnp.float32)
        kern = _linear_kernel_inplace if use_inplace else _linear_kernel_scratch
        scratch = [] if use_inplace else [pltpu.VMEM((tm, tn), jnp.float32)]
        out = pl.pallas_call(
            functools.partial(kern, compute_dtype=compute_dtype),
            out_shape=jax.ShapeDtypeStruct((M_pad, N_pad), out_dtype),
            grid_spec=pltpu.PrefetchScalarGridSpec(
                num_scalar_prefetch=0,
                grid=(grid_m, grid_n, grid_k),
                in_specs=[
                    pl.BlockSpec((tm, tk), lambda i, j, k: (i, k)),   # x tile
                    pl.BlockSpec((tk, tn), lambda i, j, k: (k, j)),   # W tile
                    pl.BlockSpec((1, tn), lambda i, j, k: (0, j)),    # bias tile
                ],
                out_specs=pl.BlockSpec((tm, tn), lambda i, j, k: (i, j)),
                scratch_shapes=scratch,
            ),
            compiler_params=pltpu.CompilerParams(
                dimension_semantics=("parallel", "parallel", "arbitrary"),
                vmem_limit_bytes=vmem_limit),
            cost_estimate=cost,
        )(x2d, w_kernel, b_kernel)

    if M_pad != M or N_pad != out_dim:
        out = out[:M, :out_dim]
    return out.reshape(*lead_shape, out_dim)


# ---------------------------------------------------------------------------
# Parameter init / one-time preparation
# ---------------------------------------------------------------------------
def init_linear_norm_params(key, in_dim, out_dim, bias=True,
                            w_init_gain="linear", dtype=jnp.float32):
    """Matches LinearNorm.__init__: Xavier-uniform weight with
    calculate_gain(w_init_gain); default nn.Linear bias init
    U(-1/sqrt(in_dim), 1/sqrt(in_dim))."""
    gains = {"linear": 1.0, "relu": math.sqrt(2.0), "tanh": 5.0 / 3.0,
             "sigmoid": 1.0}
    gain = gains[w_init_gain]
    wkey, bkey = jax.random.split(key)
    w_bound = gain * math.sqrt(6.0 / (in_dim + out_dim))
    weight = jax.random.uniform(wkey, (out_dim, in_dim), dtype,
                                minval=-w_bound, maxval=w_bound)
    if not bias:
        return weight, None
    b_bound = 1.0 / math.sqrt(in_dim)
    b = jax.random.uniform(bkey, (out_dim,), dtype,
                           minval=-b_bound, maxval=b_bound)
    return weight, b


def prepare_linear_norm_params(weight, bias=None, compute_dtype=jnp.bfloat16):
    """One-time conversion of PyTorch-layout params to kernel layout.

    weight (out_dim, in_dim) -> (K_pad, N_pad): transposed, zero-padded to
    128-aligned dims, optionally cast to the persistent compute dtype.
    bias (out_dim,) or None  -> (1, N_pad) float32.
    Do this ONCE at init so per-call forwards pay zero HBM prep traffic.
    """
    out_dim, in_dim = weight.shape
    K_pad = _round_up(in_dim, 128)
    N_pad = _round_up(out_dim, 128)
    w = weight.T                                   # (in_dim, out_dim)
    if (K_pad, N_pad) != w.shape:
        w = jnp.pad(w, ((0, K_pad - in_dim), (0, N_pad - out_dim)))
    if compute_dtype is not None:
        w = w.astype(compute_dtype)                # persistent bf16 halves W DMA
    if bias is None:
        b = jnp.zeros((1, N_pad), jnp.float32)
    else:
        b = bias.astype(jnp.float32).reshape(1, out_dim)
        if N_pad != out_dim:
            b = jnp.pad(b, ((0, 0), (0, N_pad - out_dim)))
    return w, b


class LinearNormPallas:
    """JAX/Pallas equivalent of the PyTorch LinearNorm module."""

    def __init__(self, key, in_dim, out_dim, bias=True, w_init_gain="linear",
                 dtype=jnp.float32, compute_dtype=jnp.bfloat16):
        self.in_dim, self.out_dim = in_dim, out_dim
        self.compute_dtype = compute_dtype
        self.weight, self.bias = init_linear_norm_params(
            key, in_dim, out_dim, bias=bias, w_init_gain=w_init_gain,
            dtype=dtype)
        self.w_kernel, self.b_kernel = prepare_linear_norm_params(
            self.weight, self.bias, compute_dtype=compute_dtype)

    def __call__(self, x):
        return linear_norm_forward(x, self.w_kernel, self.b_kernel,
                                   self.out_dim,
                                   compute_dtype=self.compute_dtype)


# ---------------------------------------------------------------------------
# Self-test
# ---------------------------------------------------------------------------
if __name__ == "__main__":
    key = jax.random.PRNGKey(0)
    k_x, k_p, k_x2, k_p2 = jax.random.split(key, 4)

    # Small shape consistent with the module: (batch, seq, in_dim).
    batch, seq, in_dim, out_dim = 2, 8, 32, 64
    x = jax.random.normal(k_x, (batch, seq, in_dim), jnp.float32)

    # 1) f32-compute path (single K-step kernel).
    layer_f32 = LinearNormPallas(k_p, in_dim, out_dim, w_init_gain="linear",
                                 compute_dtype=None)
    y_f32 = jax.block_until_ready(layer_f32(x))
    y_ref = jnp.dot(x, layer_f32.weight.T,
                    precision=lax.Precision.HIGHEST) + layer_f32.bias
    assert y_f32.shape == (batch, seq, out_dim)
    assert jnp.allclose(y_f32, y_ref, atol=2e-2, rtol=2e-2)

    # 2) Default bf16-compute path (f32 accumulation), same weights.
    layer_bf16 = LinearNormPallas(k_p, in_dim, out_dim, w_init_gain="linear")
    y_bf16 = jax.block_until_ready(layer_bf16(x))
    assert jnp.allclose(y_bf16, y_ref, atol=5e-2, rtol=5e-2)

    # 3) K-streaming paths: K not 128-aligned and > one tile.
    in_dim2, out_dim2 = 640, 96
    x2 = jax.random.normal(k_x2, (batch, seq, in_dim2), jnp.float32)
    layer2 = LinearNormPallas(k_p2, in_dim2, out_dim2, compute_dtype=None)
    y2 = jax.block_until_ready(layer2(x2))           # f32 in-place accumulator
    y2_ref = jnp.dot(x2, layer2.weight.T,
                     precision=lax.Precision.HIGHEST) + layer2.bias
    assert y2.shape == (batch, seq, out_dim2)
    assert jnp.allclose(y2, y2_ref, atol=2e-2, rtol=2e-2)

    layer2_bf = LinearNormPallas(k_p2, in_dim2, out_dim2)    # bf16 weights
    y3 = jax.block_until_ready(layer2_bf(x2.astype(jnp.bfloat16)))
    assert jnp.allclose(y3.astype(jnp.float32), y2_ref, atol=5e-2, rtol=5e-2)

    print("KERNEL_OK")
</pallas_src>

<mosaic_0001>
module attributes {stable_mosaic.version = 11 : i64} {
  func.func @_linear_kernel_single(%arg0: i32, %arg1: i32, %arg2: memref<8x128xf32, #tpu.memory_space<vmem>>, %arg3: memref<128x128xf32, #tpu.memory_space<vmem>>, %arg4: memref<1x128xf32, #tpu.memory_space<vmem>>, %arg5: memref<8x128xf32, #tpu.memory_space<vmem>>) attributes {dimension_semantics = [#tpu.dimension_semantics<parallel>, #tpu.dimension_semantics<parallel>], iteration_bounds = array<i64: 2, 1>, scalar_prefetch = 0 : i64, scratch_operands = 0 : i64, tpu.core_type = #tpu.core_type<tc>, window_params = [{transform_indices = @transform_0, window_bounds = array<i64: 8, 128>}, {transform_indices = @transform_1, window_bounds = array<i64: 128, 128>}, {transform_indices = @transform_2, window_bounds = array<i64: 1, 128>}, {transform_indices = @transform_3, window_bounds = array<i64: 8, 128>}]} {
    %c0 = arith.constant 0 : index
    %c0_0 = arith.constant 0 : index
    %0 = vector.load %arg2[%c0, %c0_0] : memref<8x128xf32, #tpu.memory_space<vmem>>, vector<8x128xf32>
    %c0_1 = arith.constant 0 : index
    %c0_2 = arith.constant 0 : index
    %1 = vector.load %arg3[%c0_1, %c0_2] : memref<128x128xf32, #tpu.memory_space<vmem>>, vector<128x128xf32>
    %cst = arith.constant dense<0.000000e+00> : vector<8x128xf32>
    %2 = tpu.matmul %0, %1, %cst {dimension_numbers = #tpu.dot_dimension_numbers<[1], [0], [0], [1], [0, 0, 1, 1], [], []>} : vector<8x128xf32>, vector<128x128xf32>, vector<8x128xf32> -> vector<8x128xf32>
    %c0_3 = arith.constant 0 : index
    %c0_4 = arith.constant 0 : index
    %3 = vector.load %arg4[%c0_3, %c0_4] : memref<1x128xf32, #tpu.memory_space<vmem>>, vector<1x128xf32>
    %4 = vector.broadcast %3 : vector<1x128xf32> to vector<8x128xf32>
    %5 = arith.addf %2, %4 : vector<8x128xf32>
    %c0_5 = arith.constant 0 : index
    %c0_6 = arith.constant 0 : index
    %6 = vector.load %arg5[%c0_5, %c0_6] : memref<8x128xf32, #tpu.memory_space<vmem>>, vector<8x128xf32>
    tpu.vector_store %arg5[%c0_5, %c0_6], %5 {strides = array<i32>} : memref<8x128xf32, #tpu.memory_space<vmem>>, vector<8x128xf32>,
    return
  }
  func.func @transform_0(%arg0: i32, %arg1: i32) -> (i32, i32) {
    %c0_i32 = arith.constant 0 : i32
    %c0_i32_0 = arith.constant 0 : i32
    return %arg0, %c0_i32 : i32, i32
  }
  func.func @transform_1(%arg0: i32, %arg1: i32) -> (i32, i32) {
    %c0_i32 = arith.constant 0 : i32
    %c0_i32_0 = arith.constant 0 : i32
    return %c0_i32, %arg1 : i32, i32
  }
  func.func @transform_2(%arg0: i32, %arg1: i32) -> (i32, i32) {
    %c0_i32 = arith.constant 0 : i32
    %c0_i32_0 = arith.constant 0 : i32
    return %c0_i32, %arg1 : i32, i32
  }
  func.func @transform_3(%arg0: i32, %arg1: i32) -> (i32, i32) {
    %c0_i32 = arith.constant 0 : i32
    return %arg0, %arg1 : i32, i32
  }
}

</mosaic_0001>

<bundles_post_ra>
// kernel: tpu_custom_call.1
= control target key start
LH: loop header
LB: loop body
LE: loop exit
PB: predicated region body
PF: predicated region fallthrough
CT: control target
= control target key end

     0   :  { %8 = vsyncpa [#allocation3], 0  ;;  %s818_s0 = inlined_call_operand.hbm [shape: f32[16,128], index: 0, kind: input, shape index: {}]   ;;  %s819_s1 = inlined_call_operand.hbm [shape: f32[128,128], index: 1, kind: input, shape index: {}]   ;;  %s820_s2 = inlined_call_operand.vmem [shape: f32[1,128], index: 2, kind: input, shape index: {}]   ;;  %s821_s3 = inlined_call_operand.hbm [shape: f32[16,128], index: 3, kind: output, shape index: {}]  }
   0x1   :  { %10 = vsyncpa [#allocation3 + $0x1], 0 }
   0x2   :  { %11 = vsyncpa [#allocation6], 0 }
   0x3   :  { %12 = vsyncpa [#allocation4], 0 }
   0x4   :  { %14 = vsyncpa [#allocation4 + $0x1], 0  ;;  %s665_s12 = smov 0   ;;  %s667_s13 = smov 0  }
   0x5   :  { %s669_s14 = smov 0   ;;  %s671_s15 = smov 0  }
   0x6   :  { %s673_s16 = smov 0   ;;  %s675_s17 = smov 0  }
   0x7 LB: > { %s402_s18 = sadd.s32 4294967295, %s640_s17   ;;  %p404_p0 = scmp.ge.s32.totalorder %s640_s17, 1  ;;  %s640_s17 = sphi %s675_s17, %s20_s17   ;;  %s636_s16 = sphi %s673_s16, %s832_s16   ;;  %s632_s15 = sphi %s671_s15, %s831_s15   ;;  %s628_s14 = sphi %s669_s14, %s830_s14   ;;  %s624_s13 = sphi %s667_s13, %s829_s13   ;;  %s620_s12 = sphi %s665_s12, %s828_s12  }
   0x8   : > { %p697_p1 = scmp.eq.s32.totalorder %s402_s18, 0  ;;  %p143_p2 = scmp.lt.s32.totalorder %s640_s17, 3 }
   0x9   : > { %s156_s22 = sshll.u32 %s819_s1, 4  ;;  %s642_s24 = smov [#allocation5]   ;;  %s157_s22 = int_to_ptr.hbm [resolvable:$true] %s156_s22 }
   0xa   : > { %p705_p3 = pnand %p404_p0, %p143_p2  ;;  %s158_s25 = sshll.u32 %s642_s24, 4  ;;  %s159_s25 = int_to_ptr.vmem [resolvable:$true] %s158_s25 }
   0xb   : > { %p407_p6 = scmp.ge.s32.totalorder %s640_s17, 2  ;;  %s643_s26 = smov 128  }
   0xc   : > { %p426_p4 = pneg %p705_p3  ;;  %s644_s27 = smov 8  }
   0xd   : > { %s403_s28 = sadd.s32 4294967294, %s640_s17   ;;  %s32_s29 = sadd.s32 1, %s636_s16 }
   0xe   : > { %p427_p5 = pnand %p426_p4, %p697_p1  ;;  %s39_s30 = sadd.s32 1, %s628_s14 }
   0xf   : > { %p34_p7 = scmp.ge.s32.totalorder %s32_s29, 2  ;;  %p46_p8 = scmp.ne.s32.totalorder %s628_s14, %s624_s13 }
  0x10   : > { %429 = dma.hbm_to_vmem [thread:$0]  (!%p427_p5), %s157_s22, 2048, %s159_s25, [#allocation6], %s643_s26, %s643_s26, %s644_s27  }
  0x11   : > { %p47_p9 = scmp.eq.s32.totalorder %s640_s17, 0  ;;  %p52_p10 = scmp.ne.s32.totalorder %s624_s13, %s620_s12 }
  0x12   : > { %s834_s29 = smov (%p34_p7, %s32_s29), 0  ;;  %p130_p13 = scmp.eq.s32.totalorder %s402_s18, 1 }
  0x13   : > { %p724_p11 = por %p47_p9, %p46_p8  ;;  %p730_p12 = por %p697_p1, %p52_p10 }
  0x14   : > { %s36_s6 = ssub.s32 %s636_s16, %s834_s29  ;;  %p136_p2 = scmp.eq.s32.totalorder %s403_s28, 1 }
  0x15   : > { %p37_p0 = scmp.eq.s32.totalorder %s36_s6, 0  ;;  %p736_p4 = por %p130_p13, %p46_p8 }
  0x16   : > { %p439_p5 = scmp.lt.s32.totalorder %s640_s17, 2  ;;  %p744_p7 = por %p136_p2, %p52_p10 }
  0x17   : > { %s742_s8 = scalar_select %p37_p0, %s628_s14, %s39_s30  }
  0x18   : > { %s178_s10 = sand.u32 1, %s628_s14   ;;  %s409_s20 = sshll.u32 %s636_s16, 3 }
  0x19   : > { %s408_s11 = sshll.u32 %s178_s10, 3  ;;  %s186_s18 = scalar_lea.hbm %s818_s0, %s409_s20 }
  0x1a   : > { %s182_s24 = scalar_lea.vmem [#allocation2], %s408_s11  ;;  %s188_s26 = sshll.u32 %s186_s18, 4  ;;  %s189_s26 = int_to_ptr.hbm [resolvable:$true] %s188_s26 }
  0x1b   : > { %s190_s25 = sshll.u32 %s182_s24, 4  ;;  %p431_p8 = pnand %p439_p5, %p724_p11  ;;  %s191_s25 = int_to_ptr.vmem [resolvable:$true] %s190_s25 }
  0x1c   : > { %s179_s27 = scalar_lea.sflag [#allocation3], %s178_s10  ;;  %199 = sbr.rel (%p705_p3) target bundleno = 199 (0xc7), region = 32 }
  0x1d   : > { %433 = dma.hbm_to_vmem [thread:$0]  (!%p431_p8), %s189_s26, 128, %s191_s25, %s179_s27  }
  0x1e   : > { %s758_s28 = sand.u32 (!%p705_p3), 1, %s624_s13  }
  0x1f   : > { %s411_s30 = sshll.u32 (!%p705_p3), %s758_s28, 3  ;;  %s202_s6 = scalar_lea.sflag (!%p705_p3), [#allocation3], %s758_s28 }
  0x20   : > { %s764_s11 = scalar_lea.vmem (!%p705_p3), [#allocation2], %s411_s30 }
  0x21   : > { %607 = dma.done.wait (%p730_p12), %s202_s6, 128  }
  0x22   : > { %609 = vsyncadd (%p730_p12), %s202_s6, 4294967168 }
  0x23   : > { %611 = dma.done.wait (%p697_p1), [#allocation6], 2048  }
  0x24   : > { %613 = vsyncadd (%p697_p1), [#allocation6], 4294965248  ;;  %v256_v0 = vld [vmem:[#allocation5 + $0x78] sm:$0xff]  ;;  %v255_v1 = vld [vmem:[#allocation5 + $0x70] sm:$0xff]  ;;  %s415_s19 = sshll.u32 %s632_s15, 3  ;;  %s236_s21 = scalar_lea.vmem [#allocation7], %s411_s30 }
  0x25   : > { %261 = vmatpush.msra.mxu0 %v256_v0  ;;  %v254_v2 = vld [vmem:[#allocation5 + $0x68] sm:$0xff]  ;;  %v253_v3 = vld [vmem:[#allocation5 + $0x60] sm:$0xff]  ;;  %v252_v4 = vld [vmem:[#allocation5 + $0x58] sm:$0xff]  ;;  %s294_s5 = scalar_lea.hbm %s821_s3, %s415_s19  ;;  %s296_s22 = sshll.u32 %s236_s21, 4  ;;  %s297_s22 = int_to_ptr.vmem [resolvable:$true] %s296_s22 }
  0x26   : > { %v251_v5 = vld [vmem:[#allocation5 + $0x50] sm:$0xff]  ;;  %v250_v6 = vld [vmem:[#allocation5 + $0x48] sm:$0xff]  ;;  %v249_v7 = vld [vmem:[#allocation5 + $0x40] sm:$0xff]  ;;  %s298_s18 = sshll.u32 %s294_s5, 4  ;;  %s283_s24 = scalar_lea.sflag [#allocation4], %s758_s28  ;;  %s299_s18 = int_to_ptr.hbm [resolvable:$true] %s298_s18 }
  0x27   : > { %262 = vmatpush.msra.mxu0 %v255_v1  ;;  %v248_v8 = vld [vmem:[#allocation5 + $0x38] sm:$0xff]  ;;  %v247_v9 = vld [vmem:[#allocation5 + $0x30] sm:$0xff]  ;;  %v246_v10 = vld [vmem:[#allocation5 + $0x28] sm:$0xff]  ;;  %s568_s15 = sshra.s32 %s299_s18, 4  ;;  %s574_s6 = scalar_lea.hbm %s821_s3, 16  ;;  %s569_s15 = int_to_ptr.hbm [resolvable:$true] %s568_s15 }
  0x28   : > { %v245_v11 = vld [vmem:[#allocation5 + $0x20] sm:$0xff]  ;;  %v244_v12 = vld [vmem:[#allocation5 + $0x18] sm:$0xff]  ;;  %v243_v13 = vld [vmem:[#allocation5 + $0x10] sm:$0xff]  ;;  %s570_s25 = scalar_lea.hbm %s569_s15, 8  ;;  %p575_p10 = scmp.lt.s32.totalorder %s569_s15, %s821_s3 }
  0x29   : > { %263 = vmatpush.msra.mxu0 %v254_v2  ;;  %v242_v14 = vld [vmem:[#allocation5 + $0x8] sm:$0xff]  ;;  %v241_v15 = vld [vmem:[#allocation5] sm:$0xff]  ;;  %v240_v16 = vld [vmem:[%s764_s11] sm:$0xff]  ;;  %p571_p1 = scmp.ne.s32.totalorder %s569_s15, %s570_s25  ;;  %p576_p11 = scmp.lt.s32.totalorder %s574_s6, %s570_s25 }
  0x2a   : > { %v493_v17 = vld [vmem:[%s820_s2] ss:$0 sm:$0xff] }
  0x2b   : > { %264 = vmatpush.msra.mxu0 %v253_v3  ;;  %p572_p3 = pnand %p571_p1, %p736_p4  ;;  %p577_p12 = por %p576_p11, %p575_p10 }
  0x2d   : > { %265 = vmatpush.msra.mxu0 %v252_v4  ;;  %p573_p9 = pneg %p572_p3 }
  0x2f   : > { %266 = vmatpush.msra.mxu0 %v251_v5  ;;  %p578_p13 = pnand %p577_p12, %p573_p9 }
  0x31   : > { %267 = vmatpush.msra.mxu0 %v250_v6 }
  0x33   : > { %268 = vmatpush.msra.mxu0 %v249_v7 }
  0x35   : > { %269 = vmatpush.msra.mxu0 %v248_v8 }
  0x37   : > { %270 = vmatpush.msra.mxu0 %v247_v9 }
  0x39   : > { %271 = vmatpush.msra.mxu0 %v246_v10 }
  0x3b   : > { %272 = vmatpush.msra.mxu0 %v245_v11 }
  0x3d   : > { %273 = vmatpush.msra.mxu0 %v244_v12 }
  0x3f   : > { %274 = vmatpush.msra.mxu0 %v243_v13 }
  0x41   : > { %275 = vmatpush.msra.mxu0 %v242_v14 }
  0x43   : > { %276 = vmatpush.msra.mxu0 %v241_v15 }
  0x44   : > { %277 = vmatmul.f32.vlgmr.msra.gmra.mxu0 %v240_v16 }
  0xc1   : > { %v278_v18 = vpop.f32.mrf.mxu0 }
  0xc2   : > { %v279_v19 = vadd.f32 %v493_v17, %v278_v18 }
  0xc4   : > { %281 = vst [vmem:[%s236_s21] sm:$0xff] %v279_v19 }
  0xc5   : > { %581 = shalt.err (!%p578_p13)
}
  0xc6   : > { %424 = dma.vmem_to_hbm [thread:$0]  (%p736_p4), %s297_s22, 128, %s299_s18, %s283_s24  }
  0xc7 PF: > { %s310_s28 = sand.u32 1, %s620_s12   ;;  %p435_p0 = pnand %p407_p6, %p744_p7 }
  0xc8   : > { %s311_s19 = scalar_lea.sflag [#allocation4], %s310_s28 }
  0xc9   : > { %p436_p2 = pneg %p435_p0 }
  0xcb   : > { %615 = dma.done.wait (%p436_p2), %s311_s19, 128  }
  0xcc   : > { %617 = vsyncadd (%p436_p2), %s311_s19, 4294967168  ;;  %s20_s17 = sadd.s32 1, %s640_s17   ;;  %s828_s12 = smov %s624_s13 }
  0xcd   : > { %p17_p5 = scmp.ge.s32.totalorder %s20_s17, 4   ;;  %s829_s13 = smov %s628_s14 }
  0xce   : > { %s830_s14 = smov %s742_s8  ;;  %s831_s15 = smov %s636_s16 }
  0xcf   : > { %s832_s16 = smov %s834_s29  ;;  %19 = sbr.rel (!%p17_p5) target bundleno = 7 (0x7), region = 85 }
  0xd4   :  { %317 = vsyncpa [#allocation3], 1 }
  0xd5   :  { %319 = vsyncpa [#allocation3 + $0x1], 1 }
  0xd6   :  { %320 = vsyncpa [#allocation6], 1 }
  0xd7   :  { %321 = vsyncpa [#allocation4], 1 }
  0xd8   :  { %323 = vsyncpa [#allocation4 + $0x1], 1 }

</bundles_post_ra>
